<compile_context>
chip_gen: v5e
topology: v5e:2x2
jax: 0.10.0
libtpu: 0.0.40
codegen_flags: <defaults>
</compile_context>

<pallas_src>
import functools

import jax
import jax.numpy as jnp
from jax.experimental import pallas as pl
from jax.experimental.pallas import tpu as pltpu


def _round_up(n, m):
    return ((n + m - 1) // m) * m


def deep_linear_kernel(x_ref,
                       w1_ref, b1_ref,
                       w2_ref, b2_ref,
                       w3_ref, b3_ref,
                       w4_ref, b4_ref,
                       o_ref):
    """One (TB, *) batch tile of the fused 4-layer MLP.

    All matmuls hit the MXU with f32 accumulation; bias add + ReLU stay in f32.
    Dropout(p=0.15) is eval-mode -> identity.
    """
    compute_dtype = w1_ref.dtype

    def layer(a_f32, w_ref, b_ref, relu):
        # Down-cast only at the MXU input; accumulate in f32; bias/ReLU in f32.
        a = a_f32.astype(compute_dtype)
        h = jnp.dot(a, w_ref[...], preferred_element_type=jnp.float32) + b_ref[...]
        return jnp.maximum(h, 0.0) if relu else h

    h = layer(x_ref[...].astype(jnp.float32), w1_ref, b1_ref, relu=True)
    # TODO(synk): training-mode dropout (p=0.15) would need pltpu.prng_random_bits and
    # cannot match torch's RNG stream; eval-mode forward (identity) is implemented.
    h = layer(h, w2_ref, b2_ref, relu=True)
    h = layer(h, w3_ref, b3_ref, relu=True)
    y = layer(h, w4_ref, b4_ref, relu=False)
    o_ref[...] = y.astype(o_ref.dtype)


@functools.partial(jax.jit, static_argnames=("batch_tile", "compute_dtype"))
def deep_linear_forward(x, params, *, batch_tile=256, compute_dtype=jnp.float32):
    """params: dict with w1..w4 of shape (in, out) and b1..b4 of shape (1, out)."""
    B, IN = x.shape
    HID = params["w1"].shape[1]
    OUT = params["w4"].shape[1]

    # Lane-dense feature padding (multiples of 128).
    IN_P = _round_up(IN, 128)
    HID_P = _round_up(HID, 128)
    OUT_P = _round_up(OUT, 128)

    # Sublane-dense batch padding + tiling.
    B_pad = _round_up(B, 8)
    if B_pad > batch_tile:
        TB = batch_tile
        B_pad = _round_up(B_pad, TB)
    else:
        TB = B_pad
    grid = (B_pad // TB,)

    out_dtype = x.dtype

    xp = jnp.pad(x, ((0, B_pad - B), (0, IN_P - IN))).astype(compute_dtype)

    def pad_w(w):
        i, o = w.shape
        return jnp.pad(
            w, ((0, _round_up(i, 128) - i), (0, _round_up(o, 128) - o))
        ).astype(compute_dtype)

    def pad_b(b):
        o = b.shape[-1]
        return jnp.pad(
            b.reshape(1, o), ((0, 0), (0, _round_up(o, 128) - o))
        ).astype(jnp.float32)  # bias/ReLU math stays f32 (v5e has no bf16 VPU)

    w1, w2, w3, w4 = (pad_w(params[k]) for k in ("w1", "w2", "w3", "w4"))
    b1, b2, b3, b4 = (pad_b(params[k]) for k in ("b1", "b2", "b3", "b4"))

    def resident(shape):
        # Weights/biases: same block index every grid step -> fetched once, VMEM-resident.
        return pl.BlockSpec(shape, lambda i: (0, 0))

    bpe = jnp.dtype(compute_dtype).itemsize
    flops = 2 * B_pad * (IN_P * HID_P + 2 * HID_P * HID_P + HID_P * OUT_P)
    bytes_accessed = (
        B_pad * (IN_P + OUT_P) * bpe
        + (IN_P * HID_P + 2 * HID_P * HID_P + HID_P * OUT_P) * bpe
        + (3 * HID_P + OUT_P) * 4
    )

    y_pad = pl.pallas_call(
        deep_linear_kernel,
        out_shape=jax.ShapeDtypeStruct((B_pad, OUT_P), out_dtype),
        grid=grid,
        in_specs=[
            pl.BlockSpec((TB, IN_P), lambda i: (i, 0)),       # x tile (streams per step)
            resident((IN_P, HID_P)), resident((1, HID_P)),    # w1, b1
            resident((HID_P, HID_P)), resident((1, HID_P)),   # w2, b2
            resident((HID_P, HID_P)), resident((1, HID_P)),   # w3, b3
            resident((HID_P, OUT_P)), resident((1, OUT_P)),   # w4, b4
        ],
        out_specs=pl.BlockSpec((TB, OUT_P), lambda i: (i, 0)),
        compiler_params=pltpu.CompilerParams(
            dimension_semantics=("parallel",),        # shard batch tiles on v7x megacore
            vmem_limit_bytes=48 * 1024 * 1024,        # fits v7x 64 MiB/TC VMEM budget
        ),
        cost_estimate=pl.CostEstimate(
            flops=flops, transcendentals=0, bytes_accessed=bytes_accessed),
    )(xp, w1, b1, w2, b2, w3, b3, w4, b4)

    return y_pad[:B, :OUT]


def init_deep_linear_params(key, output, hidden, inp, dtype=jnp.float32):
    """Deterministic init mimicking nn.Linear's U(-1/sqrt(fan_in), 1/sqrt(fan_in)).
    Weights stored as (in_features, out_features)."""
    dims = [(inp, hidden), (hidden, hidden), (hidden, hidden), (hidden, output)]
    params = {}
    for i, (fan_in, fan_out) in enumerate(dims, start=1):
        key, kw, kb = jax.random.split(key, 3)
        bound = 1.0 / jnp.sqrt(fan_in)
        params[f"w{i}"] = jax.random.uniform(
            kw, (fan_in, fan_out), dtype, minval=-bound, maxval=bound)
        params[f"b{i}"] = jax.random.uniform(
            kb, (1, fan_out), dtype, minval=-bound, maxval=bound)
    return params


if __name__ == "__main__":
    # deep_linear(output=16, hidden=32, input=32), batch of 8 -> x: (8, 32)
    OUTPUT, HIDDEN, INPUT, BATCH = 16, 32, 32, 8

    key = jax.random.PRNGKey(0)
    key, kx = jax.random.split(key)
    x = jax.random.normal(kx, (BATCH, INPUT), jnp.float32)
    params = init_deep_linear_params(key, OUTPUT, HIDDEN, INPUT)

    # Pure-JAX reference (4 linears, relu, eval-mode dropout), highest precision.
    def ref(x, p):
        hp = lambda a, b: jnp.dot(a, b, precision=jax.lax.Precision.HIGHEST)
        h = jnp.maximum(hp(x, p["w1"]) + p["b1"], 0.0)
        h = jnp.maximum(hp(h, p["w2"]) + p["b2"], 0.0)
        h = jnp.maximum(hp(h, p["w3"]) + p["b3"], 0.0)
        return hp(h, p["w4"]) + p["b4"]

    ref_y = ref(x, params)

    # f32 MXU path (works on all generations; tight correctness check).
    y_f32 = jax.block_until_ready(
        deep_linear_forward(x, params, compute_dtype=jnp.float32))
    assert y_f32.shape == (BATCH, OUTPUT)
    assert jnp.allclose(y_f32, ref_y, atol=2e-4, rtol=2e-4), \
        float(jnp.max(jnp.abs(y_f32 - ref_y)))

    # bf16 MXU fast path (v6e/v7x); f32 accumulation + f32 bias/ReLU -> loose tolerance.
    y_bf16 = jax.block_until_ready(
        deep_linear_forward(x, params, compute_dtype=jnp.bfloat16))
    assert y_bf16.shape == (BATCH, OUTPUT)
    assert jnp.allclose(y_bf16, ref_y, atol=1e-1, rtol=1e-1), \
        float(jnp.max(jnp.abs(y_bf16 - ref_y)))

    # Larger batch exercises the multi-tile grid path (weights stay VMEM-resident).
    xl = jax.random.normal(kx, (512, INPUT), jnp.float32)
    yl = jax.block_until_ready(deep_linear_forward(xl, params, batch_tile=256))
    assert yl.shape == (512, OUTPUT)
    assert jnp.allclose(yl, ref(xl, params), atol=2e-4, rtol=2e-4)

    print("KERNEL_OK")
</pallas_src>

<mosaic_0001>
module attributes {stable_mosaic.version = 11 : i64} {
  func.func @deep_linear_kernel(%arg0: i32, %arg1: memref<8x128xf32, #tpu.memory_space<vmem>>, %arg2: memref<128x128xf32, #tpu.memory_space<vmem>>, %arg3: memref<1x128xf32, #tpu.memory_space<vmem>>, %arg4: memref<128x128xf32, #tpu.memory_space<vmem>>, %arg5: memref<1x128xf32, #tpu.memory_space<vmem>>, %arg6: memref<128x128xf32, #tpu.memory_space<vmem>>, %arg7: memref<1x128xf32, #tpu.memory_space<vmem>>, %arg8: memref<128x128xf32, #tpu.memory_space<vmem>>, %arg9: memref<1x128xf32, #tpu.memory_space<vmem>>, %arg10: memref<8x128xf32, #tpu.memory_space<vmem>>) attributes {dimension_semantics = [#tpu.dimension_semantics<parallel>], iteration_bounds = array<i64: 1>, scalar_prefetch = 0 : i64, scratch_operands = 0 : i64, tpu.core_type = #tpu.core_type<tc>, window_params = [{transform_indices = @transform_0, window_bounds = array<i64: 8, 128>}, {pipeline_mode = #tpu.pipeline_mode<synchronous>, transform_indices = @transform_1, window_bounds = array<i64: 128, 128>}, {pipeline_mode = #tpu.pipeline_mode<synchronous>, transform_indices = @transform_2, window_bounds = array<i64: 1, 128>}, {pipeline_mode = #tpu.pipeline_mode<synchronous>, transform_indices = @transform_3, window_bounds = array<i64: 128, 128>}, {pipeline_mode = #tpu.pipeline_mode<synchronous>, transform_indices = @transform_4, window_bounds = array<i64: 1, 128>}, {pipeline_mode = #tpu.pipeline_mode<synchronous>, transform_indices = @transform_5, window_bounds = array<i64: 128, 128>}, {pipeline_mode = #tpu.pipeline_mode<synchronous>, transform_indices = @transform_6, window_bounds = array<i64: 1, 128>}, {pipeline_mode = #tpu.pipeline_mode<synchronous>, transform_indices = @transform_7, window_bounds = array<i64: 128, 128>}, {pipeline_mode = #tpu.pipeline_mode<synchronous>, transform_indices = @transform_8, window_bounds = array<i64: 1, 128>}, {transform_indices = @transform_9, window_bounds = array<i64: 8, 128>}]} {
    %c0 = arith.constant 0 : index
    %c0_0 = arith.constant 0 : index
    %0 = vector.load %arg1[%c0, %c0_0] : memref<8x128xf32, #tpu.memory_space<vmem>>, vector<8x128xf32>
    %c0_1 = arith.constant 0 : index
    %c0_2 = arith.constant 0 : index
    %1 = vector.load %arg2[%c0_1, %c0_2] : memref<128x128xf32, #tpu.memory_space<vmem>>, vector<128x128xf32>
    %cst = arith.constant dense<0.000000e+00> : vector<8x128xf32>
    %2 = tpu.matmul %0, %1, %cst {dimension_numbers = #tpu.dot_dimension_numbers<[1], [0], [0], [1], [0, 0, 1, 1], [], []>} : vector<8x128xf32>, vector<128x128xf32>, vector<8x128xf32> -> vector<8x128xf32>
    %c0_3 = arith.constant 0 : index
    %c0_4 = arith.constant 0 : index
    %3 = vector.load %arg3[%c0_3, %c0_4] : memref<1x128xf32, #tpu.memory_space<vmem>>, vector<1x128xf32>
    %4 = vector.broadcast %3 : vector<1x128xf32> to vector<8x128xf32>
    %5 = arith.addf %2, %4 : vector<8x128xf32>
    %cst_5 = arith.constant 0.000000e+00 : f32
    %6 = vector.broadcast %cst_5 : f32 to vector<8x128xf32>
    %7 = arith.maximumf %5, %6 : vector<8x128xf32>
    %c0_6 = arith.constant 0 : index
    %c0_7 = arith.constant 0 : index
    %8 = vector.load %arg4[%c0_6, %c0_7] : memref<128x128xf32, #tpu.memory_space<vmem>>, vector<128x128xf32>
    %cst_8 = arith.constant dense<0.000000e+00> : vector<8x128xf32>
    %9 = tpu.matmul %7, %8, %cst_8 {dimension_numbers = #tpu.dot_dimension_numbers<[1], [0], [0], [1], [0, 0, 1, 1], [], []>} : vector<8x128xf32>, vector<128x128xf32>, vector<8x128xf32> -> vector<8x128xf32>
    %c0_9 = arith.constant 0 : index
    %c0_10 = arith.constant 0 : index
    %10 = vector.load %arg5[%c0_9, %c0_10] : memref<1x128xf32, #tpu.memory_space<vmem>>, vector<1x128xf32>
    %11 = vector.broadcast %10 : vector<1x128xf32> to vector<8x128xf32>
    %12 = arith.addf %9, %11 : vector<8x128xf32>
    %cst_11 = arith.constant 0.000000e+00 : f32
    %13 = vector.broadcast %cst_11 : f32 to vector<8x128xf32>
    %14 = arith.maximumf %12, %13 : vector<8x128xf32>
    %c0_12 = arith.constant 0 : index
    %c0_13 = arith.constant 0 : index
    %15 = vector.load %arg6[%c0_12, %c0_13] : memref<128x128xf32, #tpu.memory_space<vmem>>, vector<128x128xf32>
    %cst_14 = arith.constant dense<0.000000e+00> : vector<8x128xf32>
    %16 = tpu.matmul %14, %15, %cst_14 {dimension_numbers = #tpu.dot_dimension_numbers<[1], [0], [0], [1], [0, 0, 1, 1], [], []>} : vector<8x128xf32>, vector<128x128xf32>, vector<8x128xf32> -> vector<8x128xf32>
    %c0_15 = arith.constant 0 : index
    %c0_16 = arith.constant 0 : index
    %17 = vector.load %arg7[%c0_15, %c0_16] : memref<1x128xf32, #tpu.memory_space<vmem>>, vector<1x128xf32>
    %18 = vector.broadcast %17 : vector<1x128xf32> to vector<8x128xf32>
    %19 = arith.addf %16, %18 : vector<8x128xf32>
    %cst_17 = arith.constant 0.000000e+00 : f32
    %20 = vector.broadcast %cst_17 : f32 to vector<8x128xf32>
    %21 = arith.maximumf %19, %20 : vector<8x128xf32>
    %c0_18 = arith.constant 0 : index
    %c0_19 = arith.constant 0 : index
    %22 = vector.load %arg8[%c0_18, %c0_19] : memref<128x128xf32, #tpu.memory_space<vmem>>, vector<128x128xf32>
    %cst_20 = arith.constant dense<0.000000e+00> : vector<8x128xf32>
    %23 = tpu.matmul %21, %22, %cst_20 {dimension_numbers = #tpu.dot_dimension_numbers<[1], [0], [0], [1], [0, 0, 1, 1], [], []>} : vector<8x128xf32>, vector<128x128xf32>, vector<8x128xf32> -> vector<8x128xf32>
    %c0_21 = arith.constant 0 : index
    %c0_22 = arith.constant 0 : index
    %24 = vector.load %arg9[%c0_21, %c0_22] : memref<1x128xf32, #tpu.memory_space<vmem>>, vector<1x128xf32>
    %25 = vector.broadcast %24 : vector<1x128xf32> to vector<8x128xf32>
    %26 = arith.addf %23, %25 : vector<8x128xf32>
    %c0_23 = arith.constant 0 : index
    %c0_24 = arith.constant 0 : index
    %27 = vector.load %arg10[%c0_23, %c0_24] : memref<8x128xf32, #tpu.memory_space<vmem>>, vector<8x128xf32>
    tpu.vector_store %arg10[%c0_23, %c0_24], %26 {strides = array<i32>} : memref<8x128xf32, #tpu.memory_space<vmem>>, vector<8x128xf32>,
    return
  }
  func.func @transform_0(%arg0: i32) -> (i32, i32) {
    %c0_i32 = arith.constant 0 : i32
    %c0_i32_0 = arith.constant 0 : i32
    return %arg0, %c0_i32 : i32, i32
  }
  func.func @transform_1(%arg0: i32) -> (i32, i32) {
    %c0_i32 = arith.constant 0 : i32
    %c0_i32_0 = arith.constant 0 : i32
    %c0_i32_1 = arith.constant 0 : i32
    return %c0_i32, %c0_i32_0 : i32, i32
  }
  func.func @transform_2(%arg0: i32) -> (i32, i32) {
    %c0_i32 = arith.constant 0 : i32
    %c0_i32_0 = arith.constant 0 : i32
    %c0_i32_1 = arith.constant 0 : i32
    return %c0_i32, %c0_i32_0 : i32, i32
  }
  func.func @transform_3(%arg0: i32) -> (i32, i32) {
    %c0_i32 = arith.constant 0 : i32
    %c0_i32_0 = arith.constant 0 : i32
    %c0_i32_1 = arith.constant 0 : i32
    return %c0_i32, %c0_i32_0 : i32, i32
  }
  func.func @transform_4(%arg0: i32) -> (i32, i32) {
    %c0_i32 = arith.constant 0 : i32
    %c0_i32_0 = arith.constant 0 : i32
    %c0_i32_1 = arith.constant 0 : i32
    return %c0_i32, %c0_i32_0 : i32, i32
  }
  func.func @transform_5(%arg0: i32) -> (i32, i32) {
    %c0_i32 = arith.constant 0 : i32
    %c0_i32_0 = arith.constant 0 : i32
    %c0_i32_1 = arith.constant 0 : i32
    return %c0_i32, %c0_i32_0 : i32, i32
  }
  func.func @transform_6(%arg0: i32) -> (i32, i32) {
    %c0_i32 = arith.constant 0 : i32
    %c0_i32_0 = arith.constant 0 : i32
    %c0_i32_1 = arith.constant 0 : i32
    return %c0_i32, %c0_i32_0 : i32, i32
  }
  func.func @transform_7(%arg0: i32) -> (i32, i32) {
    %c0_i32 = arith.constant 0 : i32
    %c0_i32_0 = arith.constant 0 : i32
    %c0_i32_1 = arith.constant 0 : i32
    return %c0_i32, %c0_i32_0 : i32, i32
  }
  func.func @transform_8(%arg0: i32) -> (i32, i32) {
    %c0_i32 = arith.constant 0 : i32
    %c0_i32_0 = arith.constant 0 : i32
    %c0_i32_1 = arith.constant 0 : i32
    return %c0_i32, %c0_i32_0 : i32, i32
  }
  func.func @transform_9(%arg0: i32) -> (i32, i32) {
    %c0_i32 = arith.constant 0 : i32
    %c0_i32_0 = arith.constant 0 : i32
    return %arg0, %c0_i32 : i32, i32
  }
}

</mosaic_0001>

<bundles_post_ra>
// kernel: deep_linear_forward.1
= control target key start
LH: loop header
LB: loop body
LE: loop exit
PB: predicated region body
PF: predicated region fallthrough
CT: control target
= control target key end

     0   :  { %s506_s0 = inlined_call_operand.vmem [shape: f32[8,128], index: 0, kind: input, shape index: {}]   ;;  %s507_s1 = inlined_call_operand.vmem [shape: f32[128,128], index: 1, kind: input, shape index: {}]   ;;  %s508_s2 = inlined_call_operand.vmem [shape: f32[1,128], index: 2, kind: input, shape index: {}]   ;;  %s509_s3 = inlined_call_operand.vmem [shape: f32[128,128], index: 3, kind: input, shape index: {}]   ;;  %s510_s4 = inlined_call_operand.vmem [shape: f32[1,128], index: 4, kind: input, shape index: {}]   ;;  %s511_s5 = inlined_call_operand.vmem [shape: f32[128,128], index: 5, kind: input, shape index: {}]   ;;  %s512_s6 = inlined_call_operand.vmem [shape: f32[1,128], index: 6, kind: input, shape index: {}]   ;;  %s513_s7 = inlined_call_operand.vmem [shape: f32[128,128], index: 7, kind: input, shape index: {}]   ;;  %s514_s8 = inlined_call_operand.vmem [shape: f32[1,128], index: 8, kind: input, shape index: {}]   ;;  %s515_s9 = inlined_call_operand.hbm [shape: f32[8,128], index: 9, kind: output, shape index: {}]  }
   0x1   :  { %v49_v0 = vld [vmem:[%s507_s1 + $0x78] sm:$0xff]  ;;  %v48_v1 = vld [vmem:[%s507_s1 + $0x70] sm:$0xff]  ;;  %v47_v2 = vld [vmem:[%s507_s1 + $0x68] sm:$0xff] }
   0x2   :  { %54 = vmatpush.msra.mxu0 %v49_v0  ;;  %v46_v3 = vld [vmem:[%s507_s1 + $0x60] sm:$0xff]  ;;  %v90_v4 = vld [vmem:[%s509_s3 + $0x78] sm:$0xff]  ;;  %v89_v6 = vld [vmem:[%s509_s3 + $0x70] sm:$0xff] }
   0x3   :  { %v45_v5 = vld [vmem:[%s507_s1 + $0x58] sm:$0xff]  ;;  %95 = vmatpush.msra.mxu1 %v90_v4  ;;  %v88_v7 = vld [vmem:[%s509_s3 + $0x68] sm:$0xff]  ;;  %v44_v8 = vld [vmem:[%s507_s1 + $0x50] sm:$0xff] }
   0x4   :  { %55 = vmatpush.msra.mxu0 %v48_v1  ;;  %v43_v9 = vld [vmem:[%s507_s1 + $0x48] sm:$0xff]  ;;  %v87_v10 = vld [vmem:[%s509_s3 + $0x60] sm:$0xff]  ;;  %v86_v11 = vld [vmem:[%s509_s3 + $0x58] sm:$0xff] }
   0x5   :  { %96 = vmatpush.msra.mxu1 %v89_v6 }
   0x6   :  { %56 = vmatpush.msra.mxu0 %v47_v2 }
   0x7   :  { %97 = vmatpush.msra.mxu1 %v88_v7 }
   0x8   :  { %57 = vmatpush.msra.mxu0 %v46_v3 }
   0xa   :  { %58 = vmatpush.msra.mxu0 %v45_v5 }
   0xc   :  { %59 = vmatpush.msra.mxu0 %v44_v8 }
   0xd   :  { %14 = vsyncpa [#allocation3], 0  ;;  %v42_v12 = vld [vmem:[%s507_s1 + $0x40] sm:$0xff]  ;;  %98 = vmatpush.msra.mxu1 %v87_v10  ;;  %v85_v13 = vld [vmem:[%s509_s3 + $0x50] sm:$0xff]  ;;  %s245_s28 = smov [#allocation2]   ;;  %s205_s10 = sshll.u32 %s515_s9, 4  ;;  %s206_s10 = int_to_ptr.hbm [resolvable:$true] %s205_s10 }
   0xe   :  { %60 = vmatpush.msra.mxu0 %v43_v9  ;;  %v41_v14 = vld [vmem:[%s507_s1 + $0x38] sm:$0xff]  ;;  %v84_v15 = vld [vmem:[%s509_s3 + $0x48] sm:$0xff]  ;;  %v40_v16 = vld [vmem:[%s507_s1 + $0x30] sm:$0xff]  ;;  %s203_s29 = sshll.u32 %s245_s28, 4  ;;  %s204_s29 = int_to_ptr.vmem [resolvable:$true] %s203_s29 }
   0xf   :  { %99 = vmatpush.msra.mxu1 %v86_v11  ;;  %v83_v17 = vld [vmem:[%s509_s3 + $0x40] sm:$0xff]  ;;  %v39_v18 = vld [vmem:[%s507_s1 + $0x28] sm:$0xff]  ;;  %v82_v19 = vld [vmem:[%s509_s3 + $0x38] sm:$0xff] }
  0x10   :  { %61 = vmatpush.msra.mxu0 %v42_v12  ;;  %v38_v20 = vld [vmem:[%s507_s1 + $0x20] sm:$0xff]  ;;  %v81_v21 = vld [vmem:[%s509_s3 + $0x30] sm:$0xff]  ;;  %v37_v22 = vld [vmem:[%s507_s1 + $0x18] sm:$0xff] }
  0x11   :  { %100 = vmatpush.msra.mxu1 %v85_v13  ;;  %v80_v23 = vld [vmem:[%s509_s3 + $0x28] sm:$0xff]  ;;  %v36_v24 = vld [vmem:[%s507_s1 + $0x10] sm:$0xff]  ;;  %v79_v25 = vld [vmem:[%s509_s3 + $0x20] sm:$0xff] }
  0x12   :  { %62 = vmatpush.msra.mxu0 %v41_v14  ;;  %v35_v26 = vld [vmem:[%s507_s1 + $0x8] sm:$0xff]  ;;  %v78_v27 = vld [vmem:[%s509_s3 + $0x18] sm:$0xff]  ;;  %v34_v28 = vld [vmem:[%s507_s1] sm:$0xff] }
  0x13   :  { %101 = vmatpush.msra.mxu1 %v84_v15  ;;  %v33_v29 = vld [vmem:[%s506_s0] sm:$0xff]  ;;  %v77_v30 = vld [vmem:[%s509_s3 + $0x10] sm:$0xff]  ;;  %v76_v31 = vld [vmem:[%s509_s3 + $0x8] sm:$0xff] }
  0x14   :  { %63 = vmatpush.msra.mxu0 %v40_v16  ;;  %v75_v32 = vld [vmem:[%s509_s3] sm:$0xff]  ;;  %v131_v33 = vld [vmem:[%s511_s5 + $0x78] sm:$0xff]  ;;  %v130_v34 = vld [vmem:[%s511_s5 + $0x70] sm:$0xff] }
  0x15   :  { %102 = vmatpush.msra.mxu1 %v83_v17  ;;  %136 = vmatpush.msra.mxu2 %v131_v33  ;;  %v129_v35 = vld [vmem:[%s511_s5 + $0x68] sm:$0xff]  ;;  %v128_v36 = vld [vmem:[%s511_s5 + $0x60] sm:$0xff]  ;;  %v127_v37 = vld [vmem:[%s511_s5 + $0x58] sm:$0xff] }
  0x16   :  { %64 = vmatpush.msra.mxu0 %v39_v18  ;;  %v126_v38 = vld [vmem:[%s511_s5 + $0x50] sm:$0xff]  ;;  %v125_v39 = vld [vmem:[%s511_s5 + $0x48] sm:$0xff]  ;;  %v124_v40 = vld [vmem:[%s511_s5 + $0x40] sm:$0xff] }
  0x17   :  { %103 = vmatpush.msra.mxu1 %v82_v19  ;;  %137 = vmatpush.msra.mxu2 %v130_v34  ;;  %v123_v41 = vld [vmem:[%s511_s5 + $0x38] sm:$0xff]  ;;  %v122_v42 = vld [vmem:[%s511_s5 + $0x30] sm:$0xff]  ;;  %v121_v43 = vld [vmem:[%s511_s5 + $0x28] sm:$0xff] }
  0x18   :  { %65 = vmatpush.msra.mxu0 %v38_v20  ;;  %v120_v44 = vld [vmem:[%s511_s5 + $0x20] sm:$0xff]  ;;  %v119_v45 = vld [vmem:[%s511_s5 + $0x18] sm:$0xff]  ;;  %v118_v50 = vld [vmem:[%s511_s5 + $0x10] sm:$0xff] }
  0x19   :  { %104 = vmatpush.msra.mxu1 %v81_v21  ;;  %138 = vmatpush.msra.mxu2 %v129_v35  ;;  %v215_v46 = vld [vmem:[%s508_s2] ss:$0 sm:$0xff]  ;;  %v117_v51 = vld [vmem:[%s511_s5 + $0x8] sm:$0xff]  ;;  %v172_v53 = vld [vmem:[%s513_s7 + $0x78] sm:$0xff] }
  0x1a   :  { %66 = vmatpush.msra.mxu0 %v37_v22  ;;  %v116_v52 = vld [vmem:[%s511_s5] sm:$0xff]  ;;  %v171_v54 = vld [vmem:[%s513_s7 + $0x70] sm:$0xff]  ;;  %177 = vmatpush.msra.mxu3 %v172_v53  ;;  %v170_v55 = vld [vmem:[%s513_s7 + $0x68] sm:$0xff] }
  0x1b   :  { %105 = vmatpush.msra.mxu1 %v80_v23  ;;  %139 = vmatpush.msra.mxu2 %v128_v36  ;;  %v169_v56 = vld [vmem:[%s513_s7 + $0x60] sm:$0xff]  ;;  %v168_v57 = vld [vmem:[%s513_s7 + $0x58] sm:$0xff]  ;;  %v167_v58 = vld [vmem:[%s513_s7 + $0x50] sm:$0xff] }
  0x1c   :  { %67 = vmatpush.msra.mxu0 %v36_v24  ;;  %178 = vmatpush.msra.mxu3 %v171_v54  ;;  %v166_v59 = vld [vmem:[%s513_s7 + $0x48] sm:$0xff]  ;;  %v165_v60 = vld [vmem:[%s513_s7 + $0x40] sm:$0xff]  ;;  %v164_v61 = vld [vmem:[%s513_s7 + $0x38] sm:$0xff] }
  0x1d   :  { %106 = vmatpush.msra.mxu1 %v79_v25  ;;  %140 = vmatpush.msra.mxu2 %v127_v37  ;;  %v163_v62 = vld [vmem:[%s513_s7 + $0x30] sm:$0xff]  ;;  %v162_v63 = vld [vmem:[%s513_s7 + $0x28] sm:$0xff]  ;;  %v161_v0 = vld [vmem:[%s513_s7 + $0x20] sm:$0xff] }
  0x1e   :  { %68 = vmatpush.msra.mxu0 %v35_v26  ;;  %179 = vmatpush.msra.mxu3 %v170_v55  ;;  %v160_v1 = vld [vmem:[%s513_s7 + $0x18] sm:$0xff]  ;;  %v216_v2 = vld [vmem:[%s510_s4] ss:$0 sm:$0xff]  ;;  %v159_v6 = vld [vmem:[%s513_s7 + $0x10] sm:$0xff] }
  0x1f   :  { %107 = vmatpush.msra.mxu1 %v78_v27  ;;  %141 = vmatpush.msra.mxu2 %v126_v38  ;;  %v158_v7 = vld [vmem:[%s513_s7 + $0x8] sm:$0xff]  ;;  %v157_v8 = vld [vmem:[%s513_s7] sm:$0xff] }
  0x20   :  { %69 = vmatpush.msra.mxu0 %v34_v28  ;;  %180 = vmatpush.msra.mxu3 %v169_v56  ;;  %v217_v9 = vld [vmem:[%s512_s6] ss:$0 sm:$0xff] }
  0x21   :  { %70 = vmatmul.f32.vlgmr.msra.gmra.mxu0 %v33_v29  ;;  %108 = vmatpush.msra.mxu1 %v77_v30  ;;  %v218_v13 = vld [vmem:[%s514_s8] ss:$0 sm:$0xff] }
  0x22   :  { %142 = vmatpush.msra.mxu2 %v125_v39  ;;  %181 = vmatpush.msra.mxu3 %v168_v57 }
  0x23   :  { %109 = vmatpush.msra.mxu1 %v76_v31 }
  0x24   :  { %143 = vmatpush.msra.mxu2 %v124_v40  ;;  %182 = vmatpush.msra.mxu3 %v167_v58 }
  0x25   :  { %110 = vmatpush.msra.mxu1 %v75_v32 }
  0x26   :  { %144 = vmatpush.msra.mxu2 %v123_v41  ;;  %183 = vmatpush.msra.mxu3 %v166_v59 }
  0x28   :  { %145 = vmatpush.msra.mxu2 %v122_v42  ;;  %184 = vmatpush.msra.mxu3 %v165_v60 }
  0x2a   :  { %146 = vmatpush.msra.mxu2 %v121_v43  ;;  %185 = vmatpush.msra.mxu3 %v164_v61 }
  0x2c   :  { %147 = vmatpush.msra.mxu2 %v120_v44  ;;  %186 = vmatpush.msra.mxu3 %v163_v62 }
  0x2e   :  { %148 = vmatpush.msra.mxu2 %v119_v45  ;;  %187 = vmatpush.msra.mxu3 %v162_v63 }
  0x30   :  { %149 = vmatpush.msra.mxu2 %v118_v50  ;;  %188 = vmatpush.msra.mxu3 %v161_v0 }
  0x32   :  { %150 = vmatpush.msra.mxu2 %v117_v51  ;;  %189 = vmatpush.msra.mxu3 %v160_v1 }
  0x34   :  { %151 = vmatpush.msra.mxu2 %v116_v52  ;;  %190 = vmatpush.msra.mxu3 %v159_v6 }
  0x36   :  { %191 = vmatpush.msra.mxu3 %v158_v7 }
  0x38   :  { %192 = vmatpush.msra.mxu3 %v157_v8 }
  0x9e   :  { %v71_v47 = vpop.f32.mrf.mxu0 }
  0x9f   :  { %v72_v48 = vadd.f32 %v215_v46, %v71_v47 }
  0xa1   :  { %v74_v49 = vmax.f32 %v72_v48, 0.0 }
  0xa3   :  { %111 = vmatmul.f32.vlgmr.msra.gmra.mxu1 %v74_v49 }
 0x120   :  { %v112_v3 = vpop.f32.mrf.mxu1 }
 0x121   :  { %v113_v4 = vadd.f32 %v216_v2, %v112_v3 }
 0x123   :  { %v115_v5 = vmax.f32 %v113_v4, 0.0 }
 0x125   :  { %152 = vmatmul.f32.vlgmr.msra.gmra.mxu2 %v115_v5 }
 0x1a8   :  { %v153_v10 = vpop.f32.mrf.mxu2 }
 0x1a9   :  { %v154_v11 = vadd.f32 %v217_v9, %v153_v10 }
 0x1ab   :  { %v156_v12 = vmax.f32 %v154_v11, 0.0 }
 0x1ad   :  { %193 = vmatmul.f32.vlgmr.msra.gmra.mxu3 %v156_v12 }
 0x230   :  { %v194_v14 = vpop.f32.mrf.mxu3 }
 0x231   :  { %v195_v15 = vadd.f32 %v218_v13, %v194_v14 }
 0x233   :  { %197 = vst [vmem:[#allocation2] sm:$0xff] %v195_v15 }
 0x234   :  { %208 = dma.vmem_to_hbm [thread:$0]  %s204_s29, 128, %s206_s10, [#allocation3]  }
 0x235   :  { %243 = dma.done.wait [#allocation3], 128  }
 0x236   :  { %244 = vsyncadd [#allocation3], 4294967168 }
 0x237   :  { %213 = vsyncpa [#allocation3], 1 }

</bundles_post_ra>
